<compile_context>
chip_gen: v5e
topology: v5e:2x2
jax: 0.10.0
libtpu: 0.0.40
codegen_flags: <defaults>
</compile_context>

<pallas_src>
import functools

import numpy as np
import jax
import jax.numpy as jnp
from jax import lax
from jax.experimental import pallas as pl
from jax.experimental.pallas import tpu as pltpu

_LANE = 128
_SUB = 8
_VMEM_BUDGET = 8 * 1024 * 1024  # per-step working-set target (fits v5e scoped default)


def _pool_kernel(x_ref, o_ref, *, factor, method, seq_len, tw, needs_mask):
    """x_ref: (tw*factor, tile_m) input rows; o_ref: (tw, tile_m) pooled rows."""
    if needs_mask:
        t = pl.program_id(1)
        # Global output-row index of each sublane row in this block.
        row = t * tw + lax.broadcasted_iota(jnp.int32, (tw, 1), 0)

    if method == "max":
        if jnp.issubdtype(x_ref.dtype, jnp.floating):
            neutral = float("-inf")
        elif x_ref.dtype == jnp.bool_:
            neutral = False
        else:
            neutral = int(jnp.iinfo(x_ref.dtype).min)
        acc = x_ref[pl.ds(0, tw, stride=factor), :]
        for k in range(1, factor):                      # factor is static -> unrolled
            v = x_ref[pl.ds(k, tw, stride=factor), :]
            if needs_mask:
                v = jnp.where(row * factor + k < seq_len, v,
                              jnp.asarray(neutral, dtype=v.dtype))
            acc = jnp.maximum(acc, v)
        o_ref[...] = acc
    else:  # 'avg'  (f32 accumulation; integer inputs would truncate on cast back)
        acc = x_ref[pl.ds(0, tw, stride=factor), :].astype(jnp.float32)
        for k in range(1, factor):
            v = x_ref[pl.ds(k, tw, stride=factor), :].astype(jnp.float32)
            if needs_mask:
                v = jnp.where(row * factor + k < seq_len, v, 0.0)
            acc = acc + v
        if needs_mask:
            cnt = jnp.clip(seq_len - row * factor, 1, factor).astype(jnp.float32)
            acc = acc / cnt                              # per-row valid-count divide
        else:
            acc = acc * (1.0 / factor)                   # compile-time constant
        o_ref[...] = acc.astype(o_ref.dtype)


def _select_tiles(L, l_out, factor, M, itemsize):
    """Pick (time tile, lane tile, padded time length) under a VMEM budget."""
    l_full = L // factor
    tile_m = M if M <= 1024 else 1024                    # full lane dim or 128-multiple
    if l_full >= _SUB:
        pad_to = 0                                       # no host-side padding needed
        row_cost = (factor + 1) * tile_m * itemsize * 2  # in + out rows, double-buffered
        tw = _VMEM_BUDGET // max(row_cost, 1)
        tw = max(_SUB, min(512, (tw // _SUB) * _SUB, (l_full // _SUB) * _SUB))
    else:
        tw = l_out                                       # very short seq: one exact block
        pad_to = l_out * factor
    # Corner case (very large factor): shrink the lane tile to bound the block size.
    block_bytes = tw * (factor + 1) * tile_m * itemsize * 2
    if block_bytes > 2 * _VMEM_BUDGET and tile_m > _LANE:
        tile_m = max(_LANE,
                     ((2 * _VMEM_BUDGET) // (tw * (factor + 1) * itemsize * 2))
                     // _LANE * _LANE)
    return tw, tile_m, pad_to


def downsample(x, method="none", factor=1, axis=1):
    methods = ("none", "avg", "max")
    if method not in methods:
        raise ValueError(f"method must be one of {methods}")
    ndim = x.ndim
    axis = axis % ndim
    L = x.shape[axis]
    if factor <= 1 or L == 0:
        return x

    if method == "none":
        # Pure strided slice; a Pallas kernel would DMA factor x the needed bytes.
        return lax.slice_in_dim(x, 0, L, stride=factor, axis=axis)

    l_out = -(-L // factor)  # ceil(L / factor)

    # Normalize to (N, L, M): pooled axis on sublanes, trailing dims on lanes.
    # This is a pure reshape (no transpose / HBM copy) unless the pooled axis
    # is the last one, in which case one swap is unavoidable.
    swapped = False
    if axis == ndim - 1 and ndim >= 2:
        x = jnp.swapaxes(x, -1, -2)
        axis = ndim - 2
        swapped = True
    lead = x.shape[:axis]
    trail = x.shape[axis + 1:]
    N = int(np.prod(lead)) if lead else 1
    M = int(np.prod(trail)) if trail else 1
    x3 = x.reshape(N, L, M)

    itemsize = jnp.dtype(x.dtype).itemsize
    tw, tile_m, pad_to = _select_tiles(L, l_out, factor, M, itemsize)
    needs_mask = (L % factor) != 0

    if pad_to > L:
        # Short-sequence fallback only: pad time to one exact window block with a
        # neutral value (at most factor-1 rows; negligible copy in this regime).
        if method == "max":
            if jnp.issubdtype(x.dtype, jnp.floating):
                pad_val = float("-inf")
            elif x.dtype == jnp.bool_:
                pad_val = False
            else:
                pad_val = int(jnp.iinfo(x.dtype).min)
        else:
            pad_val = 0
        x3 = jnp.pad(x3, ((0, 0), (0, pad_to - L), (0, 0)), constant_values=pad_val)

    nt = -(-l_out // tw)
    nm = -(-M // tile_m)

    kernel = functools.partial(
        _pool_kernel, factor=factor, method=method,
        seq_len=L, tw=tw, needs_mask=needs_mask)

    out3 = pl.pallas_call(
        kernel,
        out_shape=jax.ShapeDtypeStruct((N, l_out, M), x.dtype),
        grid_spec=pltpu.PrefetchScalarGridSpec(
            num_scalar_prefetch=0,
            grid=(N, nt, nm),
            in_specs=[pl.BlockSpec((None, tw * factor, tile_m),
                                   lambda n, t, m: (n, t, m))],
            out_specs=pl.BlockSpec((None, tw, tile_m),
                                   lambda n, t, m: (n, t, m)),
        ),
        compiler_params=pltpu.CompilerParams(
            dimension_semantics=("parallel", "parallel", "parallel"),
            vmem_limit_bytes=32 * 1024 * 1024,
        ),
    )(x3)

    out = out3.reshape(lead + (l_out,) + trail)
    if swapped:
        out = jnp.swapaxes(out, -1, -2)
    return out


def _reference(x, method, factor, axis):
    """Pure-JAX reference mirroring the PyTorch forward semantics."""
    L = x.shape[axis]
    l_out = -(-L // factor)
    x_t = jnp.moveaxis(x, axis, 0)
    if method == "none":
        y = x_t[::factor]
    else:
        pad = l_out * factor - L
        pad_widths = [(0, pad)] + [(0, 0)] * (x_t.ndim - 1)
        if method == "avg":
            xp = jnp.pad(x_t, pad_widths)
            s = xp.reshape((l_out, factor) + x_t.shape[1:]).sum(axis=1)
            cnt = jnp.minimum(factor, L - jnp.arange(l_out) * factor).astype(jnp.float32)
            y = s / cnt.reshape((l_out,) + (1,) * (x_t.ndim - 1))
        else:  # max
            xp = jnp.pad(x_t, pad_widths, constant_values=float("-inf"))
            y = xp.reshape((l_out, factor) + x_t.shape[1:]).max(axis=1)
    return jnp.moveaxis(y, 0, axis)


if __name__ == "__main__":
    key = jax.random.PRNGKey(0)
    configs = [
        # (shape, axis, factor)
        ((2, 16, 32), 1, 3),    # short sequence, ceil_mode partial last window
        ((2, 51, 160), 1, 2),   # longer sequence: no host-side pad, in-kernel mask
        ((1, 64, 256), 1, 4),   # evenly divisible: no masking path
        ((2, 6, 20), 2, 4),     # pool along the last axis (swap path)
    ]
    for shape, axis, factor in configs:
        key, sub = jax.random.split(key)
        x = jax.random.normal(sub, shape, dtype=jnp.float32)
        for method in ("none", "avg", "max"):
            y = jax.block_until_ready(
                downsample(x, method=method, factor=factor, axis=axis))
            ref = jax.block_until_ready(_reference(x, method, factor, axis))
            assert y.shape == ref.shape, (shape, axis, factor, method, y.shape, ref.shape)
            np.testing.assert_allclose(
                np.asarray(y), np.asarray(ref), rtol=1e-5, atol=1e-5,
                err_msg=f"shape={shape} axis={axis} factor={factor} method={method}")
    print("KERNEL_OK")
</pallas_src>

<mosaic_0001>
module attributes {stable_mosaic.version = 11 : i64} {
  func.func @_pool_kernel(%arg0: i32, %arg1: i32, %arg2: i32, %arg3: memref<1x18x32xf32, #tpu.memory_space<vmem>>, %arg4: memref<1x6x32xf32, #tpu.memory_space<vmem>>) attributes {dimension_semantics = [#tpu.dimension_semantics<parallel>, #tpu.dimension_semantics<parallel>, #tpu.dimension_semantics<parallel>], iteration_bounds = array<i64: 2, 1, 1>, scalar_prefetch = 0 : i64, scratch_operands = 0 : i64, tpu.core_type = #tpu.core_type<tc>, window_params = [{transform_indices = @transform_0, window_bounds = array<i64: 1, 18, 32>}, {transform_indices = @transform_1, window_bounds = array<i64: 1, 6, 32>}]} {
    %c6_i32 = arith.constant 6 : i32
    %0 = arith.muli %arg1, %c6_i32 : i32
    %1 = tpu.iota {dimensions = array<i32: 0>} : vector<6x1xi32>
    %2 = vector.broadcast %0 : i32 to vector<6x1xi32>
    %3 = arith.addi %2, %1 : vector<6x1xi32>
    %c0 = arith.constant 0 : index
    %c0_0 = arith.constant 0 : index
    %c0_1 = arith.constant 0 : index
    %4 = tpu.strided_load %arg3[%c0, %c0_0, %c0_1] {strides = array<i32: 1, 3, 1>} : memref<1x18x32xf32, #tpu.memory_space<vmem>>, vector<1x6x32xf32>
    %5 = vector.shape_cast %4 : vector<1x6x32xf32> to vector<6x32xf32>
    %c0_2 = arith.constant 0 : index
    %c1 = arith.constant 1 : index
    %c0_3 = arith.constant 0 : index
    %6 = tpu.strided_load %arg3[%c0_2, %c1, %c0_3] {strides = array<i32: 1, 3, 1>} : memref<1x18x32xf32, #tpu.memory_space<vmem>>, vector<1x6x32xf32>
    %7 = vector.shape_cast %6 : vector<1x6x32xf32> to vector<6x32xf32>
    %c3_i32 = arith.constant 3 : i32
    %8 = vector.broadcast %c3_i32 : i32 to vector<6x1xi32>
    %9 = arith.muli %3, %8 : vector<6x1xi32>
    %c1_i32 = arith.constant 1 : i32
    %10 = vector.broadcast %c1_i32 : i32 to vector<6x1xi32>
    %11 = arith.addi %9, %10 : vector<6x1xi32>
    %c16_i32 = arith.constant 16 : i32
    %12 = vector.broadcast %c16_i32 : i32 to vector<6x1xi32>
    %13 = arith.cmpi slt, %11, %12 : vector<6x1xi32>
    %cst = arith.constant 0.000000e+00 : f32
    %14 = vector.shape_cast %13 : vector<6x1xi1> to vector<6x1xi1>
    %15 = vector.broadcast %14 : vector<6x1xi1> to vector<6x32xi1>
    %16 = vector.broadcast %cst : f32 to vector<6x32xf32>
    %17 = arith.select %15, %7, %16 : vector<6x32xi1>, vector<6x32xf32>
    %18 = arith.addf %5, %17 : vector<6x32xf32>
    %c0_4 = arith.constant 0 : index
    %c2 = arith.constant 2 : index
    %c0_5 = arith.constant 0 : index
    %19 = tpu.strided_load %arg3[%c0_4, %c2, %c0_5] {strides = array<i32: 1, 3, 1>} : memref<1x18x32xf32, #tpu.memory_space<vmem>>, vector<1x6x32xf32>
    %20 = vector.shape_cast %19 : vector<1x6x32xf32> to vector<6x32xf32>
    %c3_i32_6 = arith.constant 3 : i32
    %21 = vector.broadcast %c3_i32_6 : i32 to vector<6x1xi32>
    %22 = arith.muli %3, %21 : vector<6x1xi32>
    %c2_i32 = arith.constant 2 : i32
    %23 = vector.broadcast %c2_i32 : i32 to vector<6x1xi32>
    %24 = arith.addi %22, %23 : vector<6x1xi32>
    %c16_i32_7 = arith.constant 16 : i32
    %25 = vector.broadcast %c16_i32_7 : i32 to vector<6x1xi32>
    %26 = arith.cmpi slt, %24, %25 : vector<6x1xi32>
    %cst_8 = arith.constant 0.000000e+00 : f32
    %27 = vector.shape_cast %26 : vector<6x1xi1> to vector<6x1xi1>
    %28 = vector.broadcast %27 : vector<6x1xi1> to vector<6x32xi1>
    %29 = vector.broadcast %cst_8 : f32 to vector<6x32xf32>
    %30 = arith.select %28, %20, %29 : vector<6x32xi1>, vector<6x32xf32>
    %31 = arith.addf %18, %30 : vector<6x32xf32>
    %c3_i32_9 = arith.constant 3 : i32
    %32 = vector.broadcast %c3_i32_9 : i32 to vector<6x1xi32>
    %33 = arith.muli %3, %32 : vector<6x1xi32>
    %c16_i32_10 = arith.constant 16 : i32
    %34 = vector.broadcast %c16_i32_10 : i32 to vector<6x1xi32>
    %35 = arith.subi %34, %33 : vector<6x1xi32>
    %c1_i32_11 = arith.constant 1 : i32
    %c3_i32_12 = arith.constant 3 : i32
    %36 = vector.broadcast %c1_i32_11 : i32 to vector<6x1xi32>
    %37 = arith.maxsi %36, %35 : vector<6x1xi32>
    %38 = vector.broadcast %c3_i32_12 : i32 to vector<6x1xi32>
    %39 = arith.minsi %38, %37 : vector<6x1xi32>
    %40 = arith.sitofp %39 : vector<6x1xi32> to vector<6x1xf32>
    %41 = vector.broadcast %40 : vector<6x1xf32> to vector<6x32xf32>
    %42 = arith.divf %31, %41 : vector<6x32xf32>
    %c0_13 = arith.constant 0 : index
    %c0_14 = arith.constant 0 : index
    %c0_15 = arith.constant 0 : index
    %43 = vector.load %arg4[%c0_13, %c0_14, %c0_15] : memref<1x6x32xf32, #tpu.memory_space<vmem>>, vector<1x6x32xf32>
    %44 = vector.shape_cast %43 : vector<1x6x32xf32> to vector<6x32xf32>
    %45 = vector.shape_cast %42 : vector<6x32xf32> to vector<1x6x32xf32>
    tpu.vector_store %arg4[%c0_13, %c0_14, %c0_15], %45 {strides = array<i32>} : memref<1x6x32xf32, #tpu.memory_space<vmem>>, vector<1x6x32xf32>,
    return
  }
  func.func @transform_0(%arg0: i32, %arg1: i32, %arg2: i32) -> (i32, i32, i32) {
    %c0_i32 = arith.constant 0 : i32
    return %arg0, %arg1, %arg2 : i32, i32, i32
  }
  func.func @transform_1(%arg0: i32, %arg1: i32, %arg2: i32) -> (i32, i32, i32) {
    %c0_i32 = arith.constant 0 : i32
    return %arg0, %arg1, %arg2 : i32, i32, i32
  }
}

</mosaic_0001>

<bundles_post_ra>
// kernel: tpu_custom_call.1
= control target key start
LH: loop header
LB: loop body
LE: loop exit
PB: predicated region body
PF: predicated region fallthrough
CT: control target
= control target key end

     0   :  { %s388_s6 = smov 0   ;;  %s390_s7 = smov 0   ;;  %s425_s0 = inlined_call_operand.vmem [shape: f32[2,18,32], index: 0, kind: input, shape index: {}]   ;;  %s426_s1 = inlined_call_operand.vmem [shape: f32[2,6,32], index: 1, kind: output, shape index: {}]  }
   0x1   :  { %s392_s8 = smov 0  }
   0x2 LB: > { %s30_s9 = sadd.s32 1, %s372_s7  ;;  %p320_p0 = scmp.ge.s32.totalorder %s376_s8, 1  ;;  %s376_s8 = sphi %s392_s8, %s11_s8   ;;  %s372_s7 = sphi %s390_s7, %s428_s7   ;;  %s368_s6 = sphi %s388_s6, %s427_s6  }
   0x3   : > { %p32_p1 = scmp.ge.s32.totalorder %s30_s9, 2  ;;  %p122_p2 = scmp.lt.s32.totalorder %s376_s8, 3 }
   0x5   : > { %s430_s9 = smov (%p32_p1, %s30_s9), 0  ;;  %p123_p3 = pnand %p320_p0, %p122_p2 }
   0x6   : > { %p155_p4 = scmp.lt.s32.totalorder (!%p123_p3), %s368_s6, 1 }
   0x7   : > { %126 = sbr.rel (%p123_p3) target bundleno = 46 (0x2e), region = 24 }
   0xc   : > { %v178_v0 = vlaneseq  ;;  %s432_s6 = smov (!%p155_p4, %s368_s6), 1  ;;  %vm221_vm8 = vcmask 259072  }
   0xd   : > { %s327_s10 = smul.u32 24, %s432_s6  ;;  %s322_s14 = sshll.u32 %s432_s6, 3 }
   0xe   : > { %v179_v1 = vshrl.u32 %v178_v0, 7  ;;  %s176_s17 = scalar_lea.vmem %s426_s1, %s322_s14 }
   0xf   : > { %s165_s13 = scalar_lea.vmem %s425_s0, %s327_s10 }
  0x10   : > { %v185_v2 = vmul.u32 3, %v179_v1  ;;  %v323_v8 = vld [vmem:[%s165_s13 + $0x1] ss:$3 sm:$0x3f] }
  0x11   : > { %v182_v10 = vld [vmem:[%s165_s13] ss:$3 sm:$0x3f]  ;;  %v324_v13 = vld [vmem:[%s165_s13 + $0x2] ss:$3 sm:$0x3f] }
  0x12   : > { %v200_v3 = vsub.s32 16, %v185_v2  ;;  %v186_v6 = vadd.s32 1, %v185_v2  ;;  %v194_v9 = vadd.s32 2, %v185_v2 }
  0x14   : > { %vm201_vm0 = vcmp.gt.s32.totalorder %v200_v3, 1  ;;  %vm187_vm2 = vcmp.lt.s32.totalorder %v186_v6, 16  ;;  %vm195_vm3 = vcmp.lt.s32.totalorder %v194_v9, 16 }
  0x15   : > { %v202_v4 = vsel %vm201_vm0, %v200_v3, 1  ;;  %v190_v11 = vsel %vm187_vm2, %v323_v8, 0.0  ;;  %v198_v19 = vsel %vm195_vm3, %v324_v13, 0.0 }
  0x16   : > { %vm203_vm1 = vcmp.lt.s32.totalorder %v202_v4, 3  ;;  %v191_v15 = vadd.f32 %v190_v11, %v182_v10 }
  0x17   : > { %v204_v5 = vsel %vm203_vm1, %v202_v4, 3 }
  0x18   : > { %v205_v7 = vcvt.s32.f32 %v204_v5  ;;  %v199_v22 = vadd.f32 %v198_v19, %v191_v15 }
  0x1a   : > { %352 = vrcp.f32 %v205_v7  ;;  %v217_v16 = vand.u32 2147483648, %v205_v7  ;;  %vm211_vm4 = vweird.f32 %v205_v7  ;;  %v215_v18 = vand.u32 2147483647, %v205_v7 }
  0x1c   : > { %v218_v21 = vor.u32 1.1754944e-38, %v217_v16  ;;  %vm216_vm7 = vcmp.eq.f32.partialorder %v215_v18, 8.507059e+37 }
  0x20   : > { %v353_v12 = vpop.eup %352 }
  0x21   : > { %v207_v14 = vmul.f32 %v353_v12, %v205_v7  ;;  %vm212_vm5 = vweird.f32 %v353_v12 }
  0x22   : > { %vm213_vm6 = vmor %vm211_vm4, %vm212_vm5 }
  0x23   : > { %v208_v17 = vsub.f32 1.0, %v207_v14 }
  0x25   : > { %v209_v20 = vmul.f32 %v353_v12, %v208_v17 }
  0x27   : > { %v210_v23 = vadd.f32 %v353_v12, %v209_v20 }
  0x29   : > { %v214_v24 = vsel %vm213_vm6, %v353_v12, %v210_v23 }
  0x2a   : > { %v219_v25 = vsel %vm216_vm7, %v218_v21, %v214_v24 }
  0x2b   : > { %v220_v26 = vmul.f32 %v219_v25, %v199_v22 }
  0x2d   : > { %222 = vst.msk [vmem:[%s176_s17] sm:$0x3f] %vm221_vm8, %v220_v26 }
  0x2e PF: > { %s11_s8 = sadd.s32 1, %s376_s8   ;;  %s427_s6 = smov %s372_s7 }
  0x2f   : > { %p8_p5 = scmp.ge.s32.totalorder %s11_s8, 4   ;;  %s428_s7 = smov %s430_s9 }
  0x31   :  { %10 = sbr.rel (!%p8_p5) target bundleno = 2 (0x2), region = 56 }

</bundles_post_ra>
